<compile_context>
chip_gen: v5e
topology: v5e:2x2
jax: 0.10.0
libtpu: 0.0.40
codegen_flags: <defaults>
</compile_context>

<pallas_src>
import functools

import jax
import jax.numpy as jnp
import numpy as np
from jax.experimental import pallas as pl
from jax.experimental.pallas import tpu as pltpu


def _yolso_loss_kernel(pred_ref, tgt_ref, acc_ref, *, num_classes, bg_weight,
                       hw, tile_hw, ragged):
    """Accumulate per-lane partials into acc_ref (the (4, tile_hw) output block,
    resident across the inner grid axis):
        rows 0..1 : |coord diff| for the 2 coord channels
        row  2    : |size diff|
        row  3    : weighted soft-target cross-entropy
    """
    nc = num_classes
    i = pl.program_id(1)

    pred = pred_ref[...].astype(jnp.float32)   # (C, T)
    tgt = tgt_ref[...].astype(jnp.float32)     # (C, T)

    if ragged:
        # Zero out-of-range columns of the last tile; zeroed columns contribute exactly 0
        # to every partial sum (same argument as zero padding).
        col = i * tile_hw + jax.lax.broadcasted_iota(jnp.int32, pred.shape, 1)
        valid = col < hw
        pred = jnp.where(valid, pred, 0.0)
        tgt = jnp.where(valid, tgt, 0.0)

    obj_mask = 1.0 - tgt[nc:nc + 1, :]         # (1, T)

    # L1 partials on just the coord/size rows: |mask * (pred - tgt)| == |mask*pred - mask*tgt|.
    coord_abs = jnp.abs(obj_mask * (pred[nc + 1:nc + 3, :] - tgt[nc + 1:nc + 3, :]))  # (2, T)
    size_abs = jnp.abs(obj_mask * (pred[nc + 3:nc + 4, :] - tgt[nc + 3:nc + 4, :]))   # (1, T)

    # Weighted soft-target cross-entropy over the first nc+1 (masked) channels.
    logits = obj_mask * pred[:nc + 1, :]       # (K, T)
    t = obj_mask * tgt[:nc + 1, :]             # (K, T)

    # Fuse the softmax max with the argmax==bg test (bg is the last class row):
    bg_logit = logits[nc:nc + 1, :]
    other_max = jnp.max(logits[:nc, :], axis=0, keepdims=True)
    m = jnp.maximum(other_max, bg_logit)

    z = logits - m
    lse = jnp.log(jnp.sum(jnp.exp(z), axis=0, keepdims=True))
    log_softmax = z - lse
    ce = -jnp.sum(t * log_softmax, axis=0, keepdims=True)    # (1, T)

    weight_mask = (t[nc:nc + 1, :] == 0.0) & (bg_logit > other_max)
    weights = jnp.where(weight_mask, jnp.float32(bg_weight), jnp.float32(1.0))
    wce = ce * weights                                       # (1, T)

    @pl.when(i == 0)
    def _():
        acc_ref[...] = jnp.zeros_like(acc_ref)

    acc_ref[...] += jnp.concatenate([coord_abs, size_abs, wce], axis=0)  # (4, T)


def yolso_v1_val_loss(pred_nchw, target_nchw, *, num_classes,
                      lambda_coord=1.5, lambda_size=1.0, lambda_class=1.0,
                      bg_weight=0.1, tile_hw_cap=8192):
    """Pallas implementation of YOLSOV1ValLoss.forward -> (total, coord, size, class)."""
    B, C, H, W = pred_nchw.shape
    assert C == num_classes + 4, "expected C == num_classes + 4 (module hardcodes 12 channels)"
    HW = H * W

    # Free reshapes of contiguous NCHW -- no transpose, no extra HBM pass, no dtype change.
    pred3 = pred_nchw.reshape(B, C, HW)
    tgt3 = target_nchw.reshape(B, C, HW)

    # Wide lane tiles: per-step pipeline overhead is ~0.35 us and VMEM use stays tiny
    # (2 inputs * 2 buffers * 12*tile*4 B ~= 1.5 MiB at tile 8192 -> fits v7x's 64 MiB too).
    if HW <= tile_hw_cap:
        tile_hw = HW                       # single full-extent block (always legal)
    else:
        tile_hw = (tile_hw_cap // 128) * 128
    n_tiles = pl.cdiv(HW, tile_hw)
    ragged = (HW % tile_hw) != 0

    kernel = functools.partial(_yolso_loss_kernel,
                               num_classes=num_classes, bg_weight=bg_weight,
                               hw=HW, tile_hw=tile_hw, ragged=ragged)

    acc = pl.pallas_call(
        kernel,
        out_shape=jax.ShapeDtypeStruct((B, 4, tile_hw), jnp.float32),
        grid_spec=pltpu.PrefetchScalarGridSpec(
            num_scalar_prefetch=0,
            grid=(B, n_tiles),
            in_specs=[
                pl.BlockSpec((pl.Squeezed(), C, tile_hw), lambda b, i: (b, 0, i)),
                pl.BlockSpec((pl.Squeezed(), C, tile_hw), lambda b, i: (b, 0, i)),
            ],
            # Output block is the per-batch accumulator, resident across the inner axis
            # (same block index for every i -> written back to HBM once per batch element).
            out_specs=pl.BlockSpec((pl.Squeezed(), 4, tile_hw), lambda b, i: (b, 0, 0)),
        ),
        compiler_params=pltpu.CompilerParams(
            dimension_semantics=("parallel", "arbitrary")),  # batch axis -> both TCs on v7x
    )(pred3, tgt3)

    # Tiny final reductions (B*4*tile_hw f32) done in plain JAX, with true element counts.
    n_cells = jnp.float32(B * H * W)
    coord_loss = jnp.sum(acc[:, 0:2, :]) / (2.0 * n_cells)
    size_loss = jnp.sum(acc[:, 2, :]) / n_cells
    class_loss = jnp.sum(acc[:, 3, :]) / n_cells
    total_loss = (lambda_coord * coord_loss + lambda_size * size_loss
                  + lambda_class * class_loss)
    return total_loss, coord_loss, size_loss, class_loss


def _reference_loss(pred, target, num_classes, lambda_coord=1.5, lambda_size=1.0,
                    lambda_class=1.0, bg_weight=0.1):
    """Pure-JAX reference mirroring the PyTorch module, for verification."""
    nc = num_classes
    obj_mask = (1.0 - target[:, nc, :, :])[:, None, :, :]
    obj_pred = obj_mask * pred
    obj_tgt = obj_mask * target
    coord_loss = jnp.mean(jnp.abs(obj_pred[:, nc + 1:nc + 3] - obj_tgt[:, nc + 1:nc + 3]))
    size_loss = jnp.mean(jnp.abs(obj_pred[:, nc + 3] - obj_tgt[:, nc + 3]))
    logits = obj_pred[:, :nc + 1]
    t = obj_tgt[:, :nc + 1]
    ce = -jnp.sum(t * jax.nn.log_softmax(logits, axis=1), axis=1)
    argmax = jnp.argmax(logits, axis=1)
    wm = (t[:, nc] == 0.0) & (argmax == nc)
    w = jnp.where(wm, bg_weight, 1.0)
    class_loss = jnp.mean(ce * w)
    total = lambda_coord * coord_loss + lambda_size * size_loss + lambda_class * class_loss
    return total, coord_loss, size_loss, class_loss


if __name__ == "__main__":
    # Module's `expand(-1, 12, -1, -1)` implies num_classes + 4 == 12 -> num_classes = 8.
    NUM_CLASSES = 8
    GRID_NUM = 16          # H = W = grid_num
    B, C, H, W = 2, NUM_CLASSES + 4, GRID_NUM, GRID_NUM

    key = jax.random.PRNGKey(0)
    k_pred, k_tgt, k_bg = jax.random.split(key, 3)
    pred = jax.random.normal(k_pred, (B, C, H, W), dtype=jnp.float32)
    target = jax.random.uniform(k_tgt, (B, C, H, W), dtype=jnp.float32)
    # Make the background channel binary like a real YOLSO target (so obj_mask in {0,1}).
    bg = (jax.random.uniform(k_bg, (B, H, W)) > 0.5).astype(jnp.float32)
    target = target.at[:, NUM_CLASSES, :, :].set(bg)

    out = yolso_v1_val_loss(pred, target, num_classes=NUM_CLASSES)
    out = jax.block_until_ready(out)

    ref = _reference_loss(pred, target, NUM_CLASSES)
    np.testing.assert_allclose(np.array(out), np.array(ref), rtol=1e-4, atol=1e-5)

    print("KERNEL_OK")
</pallas_src>

<mosaic_0001>
module attributes {stable_mosaic.version = 11 : i64} {
  func.func @_yolso_loss_kernel(%arg0: i32, %arg1: i32, %arg2: memref<1x12x256xf32, #tpu.memory_space<vmem>>, %arg3: memref<1x12x256xf32, #tpu.memory_space<vmem>>, %arg4: memref<1x4x256xf32, #tpu.memory_space<vmem>>) attributes {dimension_semantics = [#tpu.dimension_semantics<parallel>, #tpu.dimension_semantics<arbitrary>], iteration_bounds = array<i64: 2, 1>, scalar_prefetch = 0 : i64, scratch_operands = 0 : i64, tpu.core_type = #tpu.core_type<tc>, window_params = [{transform_indices = @transform_0, window_bounds = array<i64: 1, 12, 256>}, {transform_indices = @transform_1, window_bounds = array<i64: 1, 12, 256>}, {transform_indices = @transform_2, window_bounds = array<i64: 1, 4, 256>}]} {
    %c0 = arith.constant 0 : index
    %c0_0 = arith.constant 0 : index
    %c0_1 = arith.constant 0 : index
    %0 = vector.load %arg2[%c0, %c0_0, %c0_1] : memref<1x12x256xf32, #tpu.memory_space<vmem>>, vector<1x12x256xf32>
    %1 = vector.shape_cast %0 : vector<1x12x256xf32> to vector<12x256xf32>
    %c0_2 = arith.constant 0 : index
    %c0_3 = arith.constant 0 : index
    %c0_4 = arith.constant 0 : index
    %2 = vector.load %arg3[%c0_2, %c0_3, %c0_4] : memref<1x12x256xf32, #tpu.memory_space<vmem>>, vector<1x12x256xf32>
    %3 = vector.shape_cast %2 : vector<1x12x256xf32> to vector<12x256xf32>
    %4 = vector.extract_strided_slice %3 {offsets = [8, 0], sizes = [1, 256], strides = [1, 1]} : vector<12x256xf32> to vector<1x256xf32>
    %cst = arith.constant 1.000000e+00 : f32
    %5 = vector.broadcast %cst : f32 to vector<1x256xf32>
    %6 = arith.subf %5, %4 : vector<1x256xf32>
    %7 = vector.extract_strided_slice %1 {offsets = [9, 0], sizes = [2, 256], strides = [1, 1]} : vector<12x256xf32> to vector<2x256xf32>
    %8 = vector.extract_strided_slice %3 {offsets = [9, 0], sizes = [2, 256], strides = [1, 1]} : vector<12x256xf32> to vector<2x256xf32>
    %9 = arith.subf %7, %8 : vector<2x256xf32>
    %10 = vector.broadcast %6 : vector<1x256xf32> to vector<2x256xf32>
    %11 = arith.mulf %10, %9 : vector<2x256xf32>
    %12 = math.absf %11 : vector<2x256xf32>
    %13 = vector.extract_strided_slice %1 {offsets = [11, 0], sizes = [1, 256], strides = [1, 1]} : vector<12x256xf32> to vector<1x256xf32>
    %14 = vector.extract_strided_slice %3 {offsets = [11, 0], sizes = [1, 256], strides = [1, 1]} : vector<12x256xf32> to vector<1x256xf32>
    %15 = arith.subf %13, %14 : vector<1x256xf32>
    %16 = arith.mulf %6, %15 : vector<1x256xf32>
    %17 = math.absf %16 : vector<1x256xf32>
    %18 = vector.extract_strided_slice %1 {offsets = [0, 0], sizes = [9, 256], strides = [1, 1]} : vector<12x256xf32> to vector<9x256xf32>
    %19 = vector.broadcast %6 : vector<1x256xf32> to vector<9x256xf32>
    %20 = arith.mulf %19, %18 : vector<9x256xf32>
    %21 = vector.extract_strided_slice %3 {offsets = [0, 0], sizes = [9, 256], strides = [1, 1]} : vector<12x256xf32> to vector<9x256xf32>
    %22 = vector.broadcast %6 : vector<1x256xf32> to vector<9x256xf32>
    %23 = arith.mulf %22, %21 : vector<9x256xf32>
    %24 = vector.extract_strided_slice %20 {offsets = [8, 0], sizes = [1, 256], strides = [1, 1]} : vector<9x256xf32> to vector<1x256xf32>
    %25 = vector.extract_strided_slice %20 {offsets = [0, 0], sizes = [8, 256], strides = [1, 1]} : vector<9x256xf32> to vector<8x256xf32>
    %cst_5 = arith.constant dense<0xFF800000> : vector<256xf32>
    %26 = vector.multi_reduction <maximumf>, %25, %cst_5 [0] : vector<8x256xf32> to vector<256xf32>
    %27 = vector.shape_cast %26 : vector<256xf32> to vector<1x256xf32>
    %28 = arith.maximumf %27, %24 : vector<1x256xf32>
    %29 = vector.broadcast %28 : vector<1x256xf32> to vector<9x256xf32>
    %30 = arith.subf %20, %29 : vector<9x256xf32>
    %31 = math.exp %30 : vector<9x256xf32>
    %cst_6 = arith.constant dense<0.000000e+00> : vector<256xf32>
    %32 = vector.multi_reduction <add>, %31, %cst_6 [0] : vector<9x256xf32> to vector<256xf32>
    %33 = vector.shape_cast %32 : vector<256xf32> to vector<1x256xf32>
    %34 = math.log %33 : vector<1x256xf32>
    %35 = vector.broadcast %34 : vector<1x256xf32> to vector<9x256xf32>
    %36 = arith.subf %30, %35 : vector<9x256xf32>
    %37 = arith.mulf %23, %36 : vector<9x256xf32>
    %cst_7 = arith.constant dense<0.000000e+00> : vector<256xf32>
    %38 = vector.multi_reduction <add>, %37, %cst_7 [0] : vector<9x256xf32> to vector<256xf32>
    %39 = vector.shape_cast %38 : vector<256xf32> to vector<1x256xf32>
    %cst_8 = arith.constant 0.000000e+00 : f32
    %40 = vector.broadcast %cst_8 : f32 to vector<1x256xf32>
    %41 = arith.subf %40, %39 : vector<1x256xf32>
    %42 = vector.extract_strided_slice %23 {offsets = [8, 0], sizes = [1, 256], strides = [1, 1]} : vector<9x256xf32> to vector<1x256xf32>
    %cst_9 = arith.constant 0.000000e+00 : f32
    %43 = vector.broadcast %cst_9 : f32 to vector<1x256xf32>
    %44 = arith.cmpf oeq, %42, %43 : vector<1x256xf32>
    %45 = arith.cmpf ogt, %24, %27 : vector<1x256xf32>
    %46 = arith.andi %44, %45 : vector<1x256xi1>
    %cst_10 = arith.constant 1.000000e-01 : f32
    %cst_11 = arith.constant 1.000000e+00 : f32
    %47 = vector.broadcast %cst_10 : f32 to vector<1x256xf32>
    %48 = vector.broadcast %cst_11 : f32 to vector<1x256xf32>
    %49 = arith.select %46, %47, %48 : vector<1x256xi1>, vector<1x256xf32>
    %50 = arith.mulf %41, %49 : vector<1x256xf32>
    %c0_i32 = arith.constant 0 : i32
    %51 = arith.cmpi eq, %arg1, %c0_i32 : i32
    %52 = arith.extui %51 : i1 to i32
    %c0_i32_12 = arith.constant 0 : i32
    %53 = arith.cmpi ne, %52, %c0_i32_12 : i32
    scf.if %53 {
      %cst_19 = arith.constant 0.000000e+00 : f32
      %61 = vector.broadcast %cst_19 : f32 to vector<4x256xf32>
      %c0_20 = arith.constant 0 : index
      %c0_21 = arith.constant 0 : index
      %c0_22 = arith.constant 0 : index
      %62 = vector.load %arg4[%c0_20, %c0_21, %c0_22] : memref<1x4x256xf32, #tpu.memory_space<vmem>>, vector<1x4x256xf32>
      %63 = vector.shape_cast %62 : vector<1x4x256xf32> to vector<4x256xf32>
      %64 = vector.shape_cast %61 : vector<4x256xf32> to vector<1x4x256xf32>
      tpu.vector_store %arg4[%c0_20, %c0_21, %c0_22], %64 {strides = array<i32>} : memref<1x4x256xf32, #tpu.memory_space<vmem>>, vector<1x4x256xf32>,
    } else {
    }
    %c0_13 = arith.constant 0 : index
    %c0_14 = arith.constant 0 : index
    %c0_15 = arith.constant 0 : index
    %54 = vector.load %arg4[%c0_13, %c0_14, %c0_15] : memref<1x4x256xf32, #tpu.memory_space<vmem>>, vector<1x4x256xf32>
    %55 = vector.shape_cast %54 : vector<1x4x256xf32> to vector<4x256xf32>
    %56 = tpu.concatenate %12, %17, %50 in 0 : vector<2x256xf32>, vector<1x256xf32>, vector<1x256xf32> -> vector<4x256xf32>
    %57 = arith.addf %55, %56 : vector<4x256xf32>
    %c0_16 = arith.constant 0 : index
    %c0_17 = arith.constant 0 : index
    %c0_18 = arith.constant 0 : index
    %58 = vector.load %arg4[%c0_16, %c0_17, %c0_18] : memref<1x4x256xf32, #tpu.memory_space<vmem>>, vector<1x4x256xf32>
    %59 = vector.shape_cast %58 : vector<1x4x256xf32> to vector<4x256xf32>
    %60 = vector.shape_cast %57 : vector<4x256xf32> to vector<1x4x256xf32>
    tpu.vector_store %arg4[%c0_16, %c0_17, %c0_18], %60 {strides = array<i32>} : memref<1x4x256xf32, #tpu.memory_space<vmem>>, vector<1x4x256xf32>,
    return
  }
  func.func @transform_0(%arg0: i32, %arg1: i32) -> (i32, i32, i32) {
    %c0_i32 = arith.constant 0 : i32
    %c0_i32_0 = arith.constant 0 : i32
    return %arg0, %c0_i32, %arg1 : i32, i32, i32
  }
  func.func @transform_1(%arg0: i32, %arg1: i32) -> (i32, i32, i32) {
    %c0_i32 = arith.constant 0 : i32
    %c0_i32_0 = arith.constant 0 : i32
    return %arg0, %c0_i32, %arg1 : i32, i32, i32
  }
  func.func @transform_2(%arg0: i32, %arg1: i32) -> (i32, i32, i32) {
    %c0_i32 = arith.constant 0 : i32
    %c0_i32_0 = arith.constant 0 : i32
    %c0_i32_1 = arith.constant 0 : i32
    return %arg0, %c0_i32, %c0_i32_0 : i32, i32, i32
  }
}

</mosaic_0001>

<bundles_post_ra>
// kernel: tpu_custom_call.1
= control target key start
LH: loop header
LB: loop body
LE: loop exit
PB: predicated region body
PF: predicated region fallthrough
CT: control target
= control target key end

     0   :  { %7 = vsyncpa [#allocation3], 0  ;;  %s808_s0 = inlined_call_operand.vmem [shape: f32[2,12,256], index: 0, kind: input, shape index: {}]   ;;  %s809_s1 = inlined_call_operand.vmem [shape: f32[2,12,256], index: 1, kind: input, shape index: {}]   ;;  %s810_s2 = inlined_call_operand.hbm [shape: f32[2,4,256], index: 2, kind: output, shape index: {}]  }
   0x1   :  { %9 = vsyncpa [#allocation3 + $0x1], 0  ;;  %s656_s9 = smov 0   ;;  %s658_s10 = smov 0  }
   0x2   :  { %s660_s11 = smov 0   ;;  %s662_s12 = smov 0  }
   0x3   :  { %s664_s13 = smov 0   ;;  %s666_s14 = smov 0  }
   0x4 LB: > { %s473_s15 = sadd.s32 4294967295, %s638_s14   ;;  %s474_s16 = sadd.s32 4294967294, %s638_s14   ;;  %s638_s14 = sphi %s666_s14, %s15_s14   ;;  %s634_s13 = sphi %s664_s13, %s817_s13   ;;  %s630_s12 = sphi %s662_s12, %s816_s12   ;;  %s626_s11 = sphi %s660_s11, %s815_s11   ;;  %s622_s10 = sphi %s658_s10, %s814_s10   ;;  %s618_s9 = sphi %s656_s9, %s813_s9  }
   0x5   : > { %s27_s17 = sadd.s32 1, %s634_s13  ;;  %s90_s18 = sadd.s32 1, %s626_s11 }
   0x6   : > { %p29_p0 = scmp.ge.s32.totalorder %s27_s17, 2  ;;  %p100_p1 = scmp.ne.s32.totalorder %s626_s11, %s622_s10 }
   0x7   : > { %p101_p2 = scmp.eq.s32.totalorder %s473_s15, 1  ;;  %p106_p3 = scmp.ne.s32.totalorder %s622_s10, %s618_s9 }
   0x8   : > { %s819_s17 = smov (%p29_p0, %s27_s17), 0  ;;  %p107_p5 = scmp.eq.s32.totalorder %s474_s16, 1 }
   0x9   : > { %p696_p4 = por %p101_p2, %p100_p1  ;;  %s87_s20 = ssub.s32 %s634_s13, %s819_s17 }
   0xa   : > { %p477_p6 = scmp.ge.s32.totalorder %s638_s14, 1  ;;  %p88_p7 = scmp.eq.s32.totalorder %s87_s20, 0 }
   0xb   : > { %p703_p8 = por %p107_p5, %p106_p3  ;;  %p151_p9 = scmp.lt.s32.totalorder %s638_s14, 3 }
   0xc   : > { %s709_s22 = scalar_select %p88_p7, %s626_s11, %s90_s18  }
   0xd   : > { %p152_p10 = pnand %p477_p6, %p151_p9 }
   0xe   : > { %p187_p11 = scmp.lt.s32.totalorder (!%p152_p10), %s630_s12, 1  ;;  %s183_s3 = sand.u32 (!%p152_p10), 1, %s622_s10  }
   0xf   : > { %155 = sbr.rel (%p152_p10) target bundleno = 119 (0x77), region = 28  ;;  %s478_s4 = sshll.u32 (!%p152_p10), %s183_s3, 3 }
  0x10   : > { %s490_s5 = sshll.u32 (!%p152_p10), %s630_s12, 3  ;;  %s185_s15 = scalar_lea.vmem (!%p152_p10), [#allocation2], %s478_s4 }
  0x11   : > { %s377_s8 = scalar_lea.hbm (!%p152_p10), %s810_s2, %s490_s5  ;;  %s379_s16 = sshll.u32 (!%p152_p10), %s185_s15, 4  ;;  %s380_s16 = int_to_ptr.vmem [resolvable:$true] %s379_s16 }
  0x12   : > { %s381_s18 = sshll.u32 (!%p152_p10), %s377_s8, 4  ;;  %s580_s26 = scalar_lea.hbm (!%p152_p10), %s810_s2, 16  ;;  %s382_s18 = int_to_ptr.hbm [resolvable:$true] %s381_s18 }
  0x13   : > { %s574_s20 = sshra.s32 (!%p152_p10), %s382_s18, 4  ;;  %s575_s20 = int_to_ptr.hbm [resolvable:$true] %s574_s20 }
  0x14   : > { %s188_s23 = scalar_select %p187_p11, %s630_s12, 1  ;;  %vm270_vm0 = vcmask 1040384   ;;  %vm351_vm1 = vcmask 1041408   ;;  %vm354_vm8 = vcmask 1042432   ;;  %vm360_vm9 = vcmask 1043456  }
  0x15   : > { %s366_s12 = scalar_lea.sflag [#allocation3], %s183_s3  ;;  %p581_p1 = scmp.lt.s32.totalorder %s575_s20, %s810_s2 }
  0x16   : > { %s488_s24 = sshll.u32 %s188_s23, 5  ;;  %s576_s23 = scalar_lea.hbm %s575_s20, 8 }
  0x17   : > { %s716_s27 = scalar_lea.vmem %s809_s1, %s488_s24  ;;  %s194_s30 = scalar_lea.vmem %s808_s0, %s488_s24 }
  0x18   : > { %v208_v0 = vld [vmem:[%s194_s30 + $0x10] sm:$0xf]  ;;  %v209_v1 = vld [vmem:[%s194_s30 + $0x18] sm:$0xf]  ;;  %v206_v8 = vld [vmem:[%s194_s30] sm:$0xff]  ;;  %p577_p12 = scmp.ne.s32.totalorder %s575_s20, %s576_s23  ;;  %p582_p2 = scmp.lt.s32.totalorder %s580_s26, %s576_s23 }
  0x19   : > { %v722_v2 = vld [vmem:[%s716_s27 + $0x10] sm:$0xf]  ;;  %v725_v3 = vld [vmem:[%s716_s27 + $0x18] sm:$0xf]  ;;  %v207_v9 = vld [vmem:[%s194_s30 + $0x8] sm:$0xff] }
  0x1a   : > { %v214_v4 = vsub.f32 1.0, %v722_v2  ;;  %v215_v5 = vsub.f32 1.0, %v725_v3  ;;  %v216_v6 = vsub.f32 %v208_v0, %v722_v2  ;;  %v217_v7 = vsub.f32 %v209_v1, %v725_v3  ;;  %p578_p13 = pnand %p577_p12, %p696_p4  ;;  %p583_p3 = por %p582_p2, %p581_p1 }
  0x1c   : > { %v731_v10 = vperm.slane %v214_v4, 0  ;;  %v733_v11 = vperm.slane %v215_v5, 0  ;;  %v226_v12 = vrot.slane %v216_v6, 3  ;;  %v227_v13 = vrot.slane %v217_v7, 3  ;;  %p579_p0 = pneg %p578_p13 }
  0x1e   : > { %v220_v14 = vmul.f32 %v731_v10, %v216_v6  ;;  %v221_v15 = vmul.f32 %v733_v11, %v217_v7  ;;  %v230_v16 = vmul.f32 %v226_v12, %v214_v4  ;;  %v231_v17 = vmul.f32 %v227_v13, %v215_v5  ;;  %p584_p5 = pnand %p583_p3, %p579_p0 }
  0x1f   : > { %v234_v18 = vmul.f32 %v731_v10, %v206_v8  ;;  %v235_v19 = vmul.f32 %v733_v11, %v207_v9  ;;  %v740_v28 = vmul.f32 %v731_v10, %v208_v0  ;;  %v743_v29 = vmul.f32 %v733_v11, %v209_v1 }
  0x20   : > { %v222_v61 = vand.u32 2147483647, %v220_v14  ;;  %v223_v62 = vand.u32 2147483647, %v221_v15  ;;  %v232_v0 = vand.u32 2147483647, %v230_v16 }
  0x21   : > { %v242_v20 = vrot.slane %v234_v18, 4  ;;  %v248_v21 = vrot.slane %v235_v19, 4  ;;  %v233_v1 = vand.u32 2147483647, %v231_v17  ;;  %v210_v14 = vld [vmem:[%s716_s27] sm:$0xff]  ;;  %v211_v15 = vld [vmem:[%s716_s27 + $0x8] sm:$0xff]  ;;  %v240_v17 = vmul.f32 %v731_v10, %v722_v2 }
  0x22   : > { %v335_v8 = vrot.slane %v222_v61, 1  ;;  %v336_v9 = vrot.slane %v223_v62, 1  ;;  %v341_v12 = vrot.slane %v232_v0, 6  ;;  %v238_v16 = vmul.f32 %v731_v10, %v210_v14 }
  0x23   : > { %v243_v22 = vmax.f32 %v234_v18, %v242_v20  ;;  %v249_v23 = vmax.f32 %v235_v19, %v248_v21  ;;  %v342_v13 = vrot.slane %v233_v1, 6  ;;  %vm317_vm2 = vcmp.eq.f32.partialorder %v240_v17, 0.0 }
  0x25   : > { %v244_v24 = vrot.slane %v243_v22, 2  ;;  %v250_v25 = vrot.slane %v249_v23, 2 }
  0x27   : > { %v245_v26 = vmax.f32 %v243_v22, %v244_v24  ;;  %v251_v27 = vmax.f32 %v249_v23, %v250_v25  ;;  %v239_v23 = vmul.f32 %v733_v11, %v211_v15  ;;  %v241_v24 = vmul.f32 %v733_v11, %v725_v3 }
  0x29   : > { %v246_v30 = vrot.slane %v245_v26, 1  ;;  %v252_v31 = vrot.slane %v251_v27, 1  ;;  %vm318_vm4 = vcmp.eq.f32.partialorder %v241_v24, 0.0 }
  0x2b   : > { %v745_v32 = vmax.f32 %v245_v26, %v246_v30  ;;  %v747_v33 = vmax.f32 %v251_v27, %v252_v31 }
  0x2d   : > { %v254_v34 = vmax.f32 %v745_v32, %v740_v28  ;;  %v255_v35 = vmax.f32 %v747_v33, %v743_v29  ;;  %vm319_vm3 = vcmp.gt.f32.partialorder %v740_v28, %v745_v32  ;;  %vm320_vm5 = vcmp.gt.f32.partialorder %v743_v29, %v747_v33 }
  0x2e   : > { %vm321_vm6 = vmand %vm317_vm2, %vm319_vm3 }
  0x2f   : > { %v256_v36 = vperm.slane %v254_v34, 0  ;;  %v257_v37 = vperm.slane %v255_v35, 0  ;;  %vm322_vm7 = vmand %vm318_vm4, %vm320_vm5 }
  0x31   : > { %v258_v38 = vsub.f32 %v234_v18, %v256_v36  ;;  %v259_v39 = vsub.f32 %v235_v19, %v257_v37  ;;  %v260_v40 = vsub.f32 %v740_v28, %v256_v36  ;;  %v261_v41 = vsub.f32 %v743_v29, %v257_v37 }
  0x32   : > { %v352_v18 = vsel %vm351_vm1, %v335_v8, %v341_v12  ;;  %v353_v19 = vsel %vm351_vm1, %v336_v9, %v342_v13 }
  0x33   : > { %v262_v42 = vmul.f32 1.442695, %v258_v38  ;;  %v264_v43 = vmul.f32 1.442695, %v259_v39  ;;  %v266_v44 = vmul.f32 1.442695, %v260_v40 }
  0x34   : > { %v268_v45 = vmul.f32 1.442695, %v261_v41 }
  0x35   : > { %548 = vpow2.f32 %v262_v42 }
  0x36   : > { %550 = vpow2.f32 %v264_v43 }
  0x37   : > { %552 = vpow2.f32 %v266_v44 }
  0x38   : > { %554 = vpow2.f32 %v268_v45 }
  0x3b   : > { %v549_v46 = vpop.eup %548 }
  0x3c   : > { %v551_v47 = vpop.eup %550 }
  0x3d   : > { %v553_v48 = vpop.eup %552 }
  0x3e   : > { %v555_v49 = vpop.eup %554  ;;  %v271_v50 = vsel %vm270_vm0, %v553_v48, 0.0 }
  0x3f   : > { %v272_v51 = vadd.f32 %v549_v46, %v271_v50  ;;  %v279_v52 = vsel %vm270_vm0, %v555_v49, 0.0  ;;  %v640_v50 = vmov 1.0  }
  0x40   : > { %v280_v53 = vadd.f32 %v551_v47, %v279_v52 }
  0x41   : > { %v273_v54 = vrot.slane %v272_v51, 4 }
  0x42   : > { %v281_v55 = vrot.slane %v280_v53, 4 }
  0x43   : > { %v274_v56 = vadd.f32 %v273_v54, %v272_v51  ;;  %v323_v51 = vsel %vm321_vm6, 0.1, %v640_v50 }
  0x44   : > { %v282_v57 = vadd.f32 %v281_v55, %v280_v53  ;;  %v324_v53 = vsel %vm322_vm7, 0.1, %v640_v50 }
  0x45   : > { %v275_v58 = vrot.slane %v274_v56, 2 }
  0x46   : > { %v283_v59 = vrot.slane %v282_v57, 2 }
  0x47   : > { %v276_v60 = vadd.f32 %v275_v58, %v274_v56 }
  0x48   : > { %v284_v63 = vadd.f32 %v283_v59, %v282_v57 }
  0x49   : > { %v277_v4 = vrot.slane %v276_v60, 1 }
  0x4a   : > { %v285_v5 = vrot.slane %v284_v63, 1 }
  0x4b   : > { %v278_v6 = vadd.f32 %v277_v4, %v276_v60 }
  0x4c   : > { %v286_v7 = vadd.f32 %v285_v5, %v284_v63 }
  0x4d   : > { %556 = vlog2.f32 %v278_v6 }
  0x4e   : > { %558 = vlog2.f32 %v286_v7 }
  0x53   : > { %v557_v20 = vpop.eup %556 }
  0x54   : > { %v559_v21 = vpop.eup %558  ;;  %v288_v22 = vmul.f32 0.6931472, %v557_v20 }
  0x55   : > { %v290_v25 = vmul.f32 0.6931472, %v559_v21 }
  0x56   : > { %v291_v26 = vsub.f32 %v258_v38, %v288_v22  ;;  %v293_v27 = vsub.f32 %v260_v40, %v288_v22 }
  0x57   : > { %v292_v30 = vsub.f32 %v259_v39, %v290_v25  ;;  %v294_v31 = vsub.f32 %v261_v41, %v290_v25 }
  0x58   : > { %v295_v34 = vmul.f32 %v291_v26, %v238_v16  ;;  %v297_v35 = vmul.f32 %v293_v27, %v240_v17 }
  0x59   : > { %v296_v36 = vmul.f32 %v292_v30, %v239_v23  ;;  %v298_v37 = vmul.f32 %v294_v31, %v241_v24 }
  0x5a   : > { %v299_v42 = vsel %vm270_vm0, %v297_v35, 0.0 }
  0x5b   : > { %v300_v43 = vadd.f32 %v299_v42, %v295_v34  ;;  %v307_v2 = vsel %vm270_vm0, %v298_v37, 0.0 }
  0x5c   : > { %v308_v10 = vadd.f32 %v307_v2, %v296_v36 }
  0x5d   : > { %v301_v44 = vrot.slane %v300_v43, 4 }
  0x5e   : > { %v309_v45 = vrot.slane %v308_v10, 4 }
  0x5f   : > { %v302_v46 = vadd.f32 %v301_v44, %v300_v43 }
  0x60   : > { %v310_v3 = vadd.f32 %v309_v45, %v308_v10 }
  0x61   : > { %v303_v11 = vrot.slane %v302_v46, 2 }
  0x62   : > { %v311_v38 = vrot.slane %v310_v3, 2 }
  0x63   : > { %v304_v39 = vadd.f32 %v303_v11, %v302_v46 }
  0x64   : > { %v312_v40 = vadd.f32 %v311_v38, %v310_v3 }
  0x65   : > { %v305_v41 = vrot.slane %v304_v39, 1 }
  0x66   : > { %v313_v47 = vrot.slane %v312_v40, 1 }
  0x67   : > { %v306_v48 = vadd.f32 %v305_v41, %v304_v39 }
  0x68   : > { %v314_v49 = vadd.f32 %v313_v47, %v312_v40 }
  0x69   : > { %v315_v52 = vsub.f32 0.0, %v306_v48 }
  0x6a   : > { %v316_v54 = vsub.f32 0.0, %v314_v49 }
  0x6b   : > { %v325_v28 = vmul.f32 %v323_v51, %v315_v52 }
  0x6c   : > { %v326_v32 = vmul.f32 %v324_v53, %v316_v54 }
  0x6d   : > { %v347_v55 = vrot.slane %v325_v28, 5 }
  0x6e   : > { %v348_v29 = vrot.slane %v326_v32, 5 }
  0x6f   : > { %v355_v33 = vsel %vm354_vm8, %v352_v18, %v347_v55 }
  0x70   : > { %v356_v56 = vsel %vm354_vm8, %v353_v19, %v348_v29 }
  0x71   : > { %v359_v57 = vrot.slane %v356_v56, 4 }
  0x73   : > { %v361_v58 = vsel %vm360_vm9, %v355_v33, %v359_v57 }
  0x74   : > { %364 = vst [vmem:[%s185_s15] sm:$0xff] %v361_v58 }
  0x75   : > { %587 = shalt.err (!%p584_p5)
}
  0x76   : > { %491 = dma.vmem_to_hbm [thread:$0]  (%p696_p4), %s380_s16, 128, %s382_s18, %s366_s12  }
  0x77 PF: > { %p497_p6 = scmp.ge.s32.totalorder %s638_s14, 2  ;;  %s393_s29 = sand.u32 1, %s618_s9  }
  0x78   : > { %s394_s30 = scalar_lea.sflag [#allocation3], %s393_s29 }
  0x79   : > { %p494_p7 = pnand %p497_p6, %p703_p8 }
  0x7b   : > { %p495_p9 = pneg %p494_p7 }
  0x7d   : > { %613 = dma.done.wait (%p495_p9), %s394_s30, 128  }
  0x7e   : > { %615 = vsyncadd (%p495_p9), %s394_s30, 4294967168  ;;  %s15_s14 = sadd.s32 1, %s638_s14   ;;  %s813_s9 = smov %s622_s10 }
  0x7f   : > { %p12_p10 = scmp.ge.s32.totalorder %s15_s14, 4   ;;  %s814_s10 = smov %s626_s11 }
  0x80   : > { %s815_s11 = smov %s709_s22  ;;  %s816_s12 = smov %s634_s13 }
  0x81   : > { %s817_s13 = smov %s819_s17  ;;  %14 = sbr.rel (!%p12_p10) target bundleno = 4 (0x4), region = 70 }
  0x86   :  { %400 = vsyncpa [#allocation3], 1 }
  0x87   :  { %402 = vsyncpa [#allocation3 + $0x1], 1 }

</bundles_post_ra>
